<compile_context>
chip_gen: v7x
topology: tpu7x:2x2x1
jax: 0.10.0
libtpu: 0.0.40
codegen_flags: <defaults>
</compile_context>

<pallas_src>
import functools
import math

import jax
import jax.numpy as jnp
from jax.experimental import pallas as pl
from jax.experimental.pallas import tpu as pltpu

_LANE = 128
_SUBLANE = {4: 8, 2: 16, 1: 32}   # sublane tile per itemsize


def _spatial_se_kernel(w_ref, b_ref, x_ref, o_ref, *, batches, channels):
    """One (batches*channels, T) block of the packed (N*C, H*W) layout.

    w_ref : (C,) f32, SMEM  -- 1x1 conv weight (C -> 1)
    b_ref : (1,) f32, SMEM  -- conv bias
    x_ref : (batches*channels, T) VMEM    -- T is lane-dense (multiple of 128)
    o_ref : (batches*channels, T) VMEM
    """
    x = x_ref[...]
    groups = []
    # batches/channels are small static constants -> unrolled VPU code.
    # (For very large C one would switch this to a fori_loop / MXU squeeze.)
    for n in range(batches):
        r0 = n * channels
        # Squeeze: weighted channel sum with f32 accumulation (the f32 SMEM
        # scalar promotes bf16 rows per element; no whole-tile cast).
        acc = x[r0:r0 + 1, :] * w_ref[0]
        for c in range(1, channels):
            acc = acc + x[r0 + c:r0 + c + 1, :] * w_ref[c]
        gate = jax.nn.sigmoid(acc + b_ref[0])                 # (1, T) f32, EUP
        # Excite: keep the input dtype (bf16 stays packed on v6e/v7x VALUs).
        groups.append(x[r0:r0 + channels, :] * gate.astype(x.dtype))
    out = groups[0] if batches == 1 else jnp.concatenate(groups, axis=0)
    o_ref[...] = out.astype(o_ref.dtype)                      # one dense store


def _vmem_capacity_bytes():
    """Per-TensorCore VMEM capacity (128 MiB v5e/v6e, 64 MiB v7x)."""
    try:
        cap = int(pltpu.get_tpu_info().vmem_capacity_bytes)
        if cap > 0:
            return cap
    except Exception:
        pass
    return 64 << 20   # conservative fallback (v7x has the smallest VMEM)


def _choose_tiling(n, c, hw, itemsize, budget_bytes):
    """Pick (batches_per_block, spatial_tile, working_set_bytes).

    Blocks are (batches*C, T) slices of the packed (N*C, H*W) array:
      * T is a multiple of 128 (or the full H*W when H*W < 128) -> lane-dense.
      * batches*C is a multiple of the sublane tile when N allows it, else the
        full row extent (always a legal block dim) -> sublane-dense.
      * The working set (double-buffered input + output blocks) is estimated
        with sublane/lane padding and kept under `budget_bytes`.
      * If the whole problem fits in a single block, the spatial tile
        (preferred) or the batch block is split so a 'parallel' grid axis has
        >= 2 steps, keeping both v7x TensorCores busy.
    """
    sub = _SUBLANE.get(itemsize, 8)

    def padded_block_bytes(rows, cols):
        prows = ((rows + sub - 1) // sub) * sub
        pcols = ((cols + _LANE - 1) // _LANE) * _LANE
        return prows * pcols * itemsize

    def working_set(gb, t):               # 2 buffers x (input + output)
        return 4 * padded_block_bytes(gb * c, t)

    # Batches per block: smallest count making gb*C a sublane-tile multiple.
    g = sub // math.gcd(c, sub)
    gb = g if g <= n else n

    # Spatial tile: largest multiple of 128 under budget (full extent if small).
    t_max = hw if hw < _LANE else (hw // _LANE) * _LANE
    t = t_max
    if t_max >= _LANE:
        prows = ((gb * c + sub - 1) // sub) * sub
        max_cols = budget_bytes // (4 * prows * itemsize)
        t = min(t_max, max(_LANE, (max_cols // _LANE) * _LANE))

    # Spend any leftover budget on more batches per block (keeps gb*C aligned).
    while gb * 2 <= n and working_set(gb * 2, t) <= budget_bytes:
        gb *= 2

    # Guarantee >= 2 grid steps for megacore sharding when the shape allows.
    steps = (-(-n // gb)) * (-(-hw // t))
    if steps < 2:
        if t >= 2 * _LANE:
            t = max(_LANE, (t // 2 // _LANE) * _LANE)
        elif gb >= 2 and ((gb // 2) * c) % sub == 0:
            gb //= 2

    return gb, t, working_set(gb, t)


def spatial_se_layer(x_nchw, conv_w=None, conv_b=None, weights=None):
    """SpatialSELayer.forward.

    x_nchw : (N, C, H, W)
    conv_w : (1, C, 1, 1)  nn.Conv2d(C, 1, 1) weight
    conv_b : (1,)          nn.Conv2d bias
    weights: optional few-shot weights (K, C); if given, mean(weights, 0) is
             used as the 1x1 conv weight with no bias (PyTorch `weights` branch).
    """
    N, C, H, W = x_nchw.shape
    HW = H * W

    if weights is not None:
        w = jnp.mean(weights, axis=0).reshape(C).astype(jnp.float32)
        b = jnp.zeros((1,), jnp.float32)
    else:
        w = conv_w.reshape(C).astype(jnp.float32)
        b = (conv_b if conv_b is not None
             else jnp.zeros((1,), jnp.float32)).reshape(1).astype(jnp.float32)

    # Free contiguous view: batch*channel on sublanes, H*W on lanes.
    x2 = x_nchw.reshape(N * C, HW)

    itemsize = jnp.dtype(x_nchw.dtype).itemsize
    cap = _vmem_capacity_bytes()
    budget = min(cap // 2, 48 << 20)           # v5e/v6e -> 48 MiB, v7x -> 32 MiB
    GB, T, ws = _choose_tiling(N, C, HW, itemsize, budget)
    vmem_limit = int(min(cap, max(ws + (8 << 20), 32 << 20)))

    grid = (-(-N // GB), -(-HW // T))          # cdiv; ragged edges masked by Pallas

    kernel = functools.partial(_spatial_se_kernel, batches=GB, channels=C)

    out2 = pl.pallas_call(
        kernel,
        out_shape=jax.ShapeDtypeStruct((N * C, HW), x_nchw.dtype),
        grid_spec=pltpu.PrefetchScalarGridSpec(
            num_scalar_prefetch=0,
            grid=grid,
            in_specs=[
                pl.BlockSpec(memory_space=pltpu.MemorySpace.SMEM),   # w (C,)
                pl.BlockSpec(memory_space=pltpu.MemorySpace.SMEM),   # b (1,)
                pl.BlockSpec((GB * C, T), lambda r, s: (r, s)),
            ],
            out_specs=pl.BlockSpec((GB * C, T), lambda r, s: (r, s)),
        ),
        compiler_params=pltpu.CompilerParams(
            dimension_semantics=("parallel", "parallel"),
            vmem_limit_bytes=vmem_limit),
    )(w, b, x2)

    return out2.reshape(N, C, H, W)


def _reference(x, conv_w, conv_b):
    """Pure-JAX reference mirroring the PyTorch module (NCHW, 1x1 conv + bias)."""
    y = jax.lax.conv_general_dilated(
        x, conv_w, window_strides=(1, 1), padding="VALID",
        dimension_numbers=("NCHW", "OIHW", "NCHW"))
    y = y + conv_b.reshape(1, 1, 1, 1)
    return x * jax.nn.sigmoid(y)


if __name__ == "__main__":
    key = jax.random.PRNGKey(0)
    k_x, k_w, k_b, k_fw = jax.random.split(key, 4)

    N, C, H, W = 2, 4, 16, 16
    x = jax.random.normal(k_x, (N, C, H, W), dtype=jnp.float32)
    conv_w = jax.random.normal(k_w, (1, C, 1, 1), dtype=jnp.float32) * 0.5
    conv_b = jax.random.normal(k_b, (1,), dtype=jnp.float32) * 0.1

    # Main forward (f32).
    out = jax.block_until_ready(spatial_se_layer(x, conv_w, conv_b))
    ref = _reference(x, conv_w, conv_b)
    assert out.shape == (N, C, H, W)
    assert jnp.allclose(out, ref, atol=1e-5, rtol=1e-5), \
        float(jnp.max(jnp.abs(out - ref)))

    # Few-shot weights branch (mean over K, no bias).
    fw = jax.random.normal(k_fw, (3, C), dtype=jnp.float32) * 0.3
    out_fs = jax.block_until_ready(spatial_se_layer(x, weights=fw))
    ref_fs = _reference(x, jnp.mean(fw, axis=0).reshape(1, C, 1, 1),
                        jnp.zeros((1,), jnp.float32))
    assert jnp.allclose(out_fs, ref_fs, atol=1e-5, rtol=1e-5), \
        float(jnp.max(jnp.abs(out_fs - ref_fs)))

    # bf16 path: excite stays in bf16 (no whole-tile f32 cast).
    xb = x.astype(jnp.bfloat16)
    out_b = jax.block_until_ready(spatial_se_layer(xb, conv_w, conv_b))
    ref_b = _reference(xb.astype(jnp.float32), conv_w, conv_b)
    assert out_b.dtype == jnp.bfloat16
    assert jnp.allclose(out_b.astype(jnp.float32), ref_b, atol=5e-2, rtol=5e-2), \
        float(jnp.max(jnp.abs(out_b.astype(jnp.float32) - ref_b)))

    print("KERNEL_OK")
</pallas_src>

<mosaic_0001>
module attributes {stable_mosaic.version = 11 : i64} {
  func.func @_spatial_se_kernel(%arg0: i32, %arg1: i32, %arg2: memref<4xf32, #tpu.memory_space<smem>>, %arg3: memref<1xf32, #tpu.memory_space<smem>>, %arg4: memref<8x128xf32, #tpu.memory_space<vmem>>, %arg5: memref<8x128xf32, #tpu.memory_space<vmem>>) attributes {dimension_semantics = [#tpu.dimension_semantics<parallel>, #tpu.dimension_semantics<parallel>], iteration_bounds = array<i64: 1, 2>, scalar_prefetch = 0 : i64, scratch_operands = 0 : i64, tpu.core_type = #tpu.core_type<tc>, window_params = [{transform_indices = @transform_0, window_bounds = array<i64: 4>}, {transform_indices = @transform_1, window_bounds = array<i64: 1>}, {transform_indices = @transform_2, window_bounds = array<i64: 8, 128>}, {transform_indices = @transform_3, window_bounds = array<i64: 8, 128>}]} {
    %c0 = arith.constant 0 : index
    %c0_0 = arith.constant 0 : index
    %0 = vector.load %arg4[%c0, %c0_0] : memref<8x128xf32, #tpu.memory_space<vmem>>, vector<8x128xf32>
    %1 = vector.extract_strided_slice %0 {offsets = [0, 0], sizes = [1, 128], strides = [1, 1]} : vector<8x128xf32> to vector<1x128xf32>
    %c0_1 = arith.constant 0 : index
    %2 = memref.load %arg2[%c0_1] : memref<4xf32, #tpu.memory_space<smem>>
    %3 = vector.broadcast %2 : f32 to vector<1x128xf32>
    %4 = arith.mulf %1, %3 : vector<1x128xf32>
    %5 = vector.extract_strided_slice %0 {offsets = [1, 0], sizes = [1, 128], strides = [1, 1]} : vector<8x128xf32> to vector<1x128xf32>
    %c1 = arith.constant 1 : index
    %6 = memref.load %arg2[%c1] : memref<4xf32, #tpu.memory_space<smem>>
    %7 = vector.broadcast %6 : f32 to vector<1x128xf32>
    %8 = arith.mulf %5, %7 : vector<1x128xf32>
    %9 = arith.addf %4, %8 : vector<1x128xf32>
    %10 = vector.extract_strided_slice %0 {offsets = [2, 0], sizes = [1, 128], strides = [1, 1]} : vector<8x128xf32> to vector<1x128xf32>
    %c2 = arith.constant 2 : index
    %11 = memref.load %arg2[%c2] : memref<4xf32, #tpu.memory_space<smem>>
    %12 = vector.broadcast %11 : f32 to vector<1x128xf32>
    %13 = arith.mulf %10, %12 : vector<1x128xf32>
    %14 = arith.addf %9, %13 : vector<1x128xf32>
    %15 = vector.extract_strided_slice %0 {offsets = [3, 0], sizes = [1, 128], strides = [1, 1]} : vector<8x128xf32> to vector<1x128xf32>
    %c3 = arith.constant 3 : index
    %16 = memref.load %arg2[%c3] : memref<4xf32, #tpu.memory_space<smem>>
    %17 = vector.broadcast %16 : f32 to vector<1x128xf32>
    %18 = arith.mulf %15, %17 : vector<1x128xf32>
    %19 = arith.addf %14, %18 : vector<1x128xf32>
    %c0_2 = arith.constant 0 : index
    %20 = memref.load %arg3[%c0_2] : memref<1xf32, #tpu.memory_space<smem>>
    %21 = vector.broadcast %20 : f32 to vector<1x128xf32>
    %22 = arith.addf %19, %21 : vector<1x128xf32>
    %23 = arith.negf %22 : vector<1x128xf32>
    %24 = math.exp %23 : vector<1x128xf32>
    %cst = arith.constant 1.000000e+00 : f32
    %25 = vector.broadcast %cst : f32 to vector<1x128xf32>
    %26 = arith.addf %25, %24 : vector<1x128xf32>
    %27 = arith.divf %25, %26 : vector<1x128xf32>
    %28 = vector.extract_strided_slice %0 {offsets = [0, 0], sizes = [4, 128], strides = [1, 1]} : vector<8x128xf32> to vector<4x128xf32>
    %29 = vector.broadcast %27 : vector<1x128xf32> to vector<4x128xf32>
    %30 = arith.mulf %28, %29 : vector<4x128xf32>
    %31 = vector.extract_strided_slice %0 {offsets = [4, 0], sizes = [1, 128], strides = [1, 1]} : vector<8x128xf32> to vector<1x128xf32>
    %c0_3 = arith.constant 0 : index
    %32 = memref.load %arg2[%c0_3] : memref<4xf32, #tpu.memory_space<smem>>
    %33 = vector.broadcast %32 : f32 to vector<1x128xf32>
    %34 = arith.mulf %31, %33 : vector<1x128xf32>
    %35 = vector.extract_strided_slice %0 {offsets = [5, 0], sizes = [1, 128], strides = [1, 1]} : vector<8x128xf32> to vector<1x128xf32>
    %c1_4 = arith.constant 1 : index
    %36 = memref.load %arg2[%c1_4] : memref<4xf32, #tpu.memory_space<smem>>
    %37 = vector.broadcast %36 : f32 to vector<1x128xf32>
    %38 = arith.mulf %35, %37 : vector<1x128xf32>
    %39 = arith.addf %34, %38 : vector<1x128xf32>
    %40 = vector.extract_strided_slice %0 {offsets = [6, 0], sizes = [1, 128], strides = [1, 1]} : vector<8x128xf32> to vector<1x128xf32>
    %c2_5 = arith.constant 2 : index
    %41 = memref.load %arg2[%c2_5] : memref<4xf32, #tpu.memory_space<smem>>
    %42 = vector.broadcast %41 : f32 to vector<1x128xf32>
    %43 = arith.mulf %40, %42 : vector<1x128xf32>
    %44 = arith.addf %39, %43 : vector<1x128xf32>
    %45 = vector.extract_strided_slice %0 {offsets = [7, 0], sizes = [1, 128], strides = [1, 1]} : vector<8x128xf32> to vector<1x128xf32>
    %c3_6 = arith.constant 3 : index
    %46 = memref.load %arg2[%c3_6] : memref<4xf32, #tpu.memory_space<smem>>
    %47 = vector.broadcast %46 : f32 to vector<1x128xf32>
    %48 = arith.mulf %45, %47 : vector<1x128xf32>
    %49 = arith.addf %44, %48 : vector<1x128xf32>
    %c0_7 = arith.constant 0 : index
    %50 = memref.load %arg3[%c0_7] : memref<1xf32, #tpu.memory_space<smem>>
    %51 = vector.broadcast %50 : f32 to vector<1x128xf32>
    %52 = arith.addf %49, %51 : vector<1x128xf32>
    %53 = arith.negf %52 : vector<1x128xf32>
    %54 = math.exp %53 : vector<1x128xf32>
    %cst_8 = arith.constant 1.000000e+00 : f32
    %55 = vector.broadcast %cst_8 : f32 to vector<1x128xf32>
    %56 = arith.addf %55, %54 : vector<1x128xf32>
    %57 = arith.divf %55, %56 : vector<1x128xf32>
    %58 = vector.extract_strided_slice %0 {offsets = [4, 0], sizes = [4, 128], strides = [1, 1]} : vector<8x128xf32> to vector<4x128xf32>
    %59 = vector.broadcast %57 : vector<1x128xf32> to vector<4x128xf32>
    %60 = arith.mulf %58, %59 : vector<4x128xf32>
    %61 = tpu.concatenate %30, %60 in 0 : vector<4x128xf32>, vector<4x128xf32> -> vector<8x128xf32>
    %c0_9 = arith.constant 0 : index
    %c0_10 = arith.constant 0 : index
    %62 = vector.load %arg5[%c0_9, %c0_10] : memref<8x128xf32, #tpu.memory_space<vmem>>, vector<8x128xf32>
    tpu.vector_store %arg5[%c0_9, %c0_10], %61 {strides = array<i32>} : memref<8x128xf32, #tpu.memory_space<vmem>>, vector<8x128xf32>,
    return
  }
  func.func @transform_0(%arg0: i32, %arg1: i32) -> i32 {
    %c0_i32 = arith.constant 0 : i32
    %c0_i32_0 = arith.constant 0 : i32
    return %c0_i32 : i32
  }
  func.func @transform_1(%arg0: i32, %arg1: i32) -> i32 {
    %c0_i32 = arith.constant 0 : i32
    %c0_i32_0 = arith.constant 0 : i32
    return %c0_i32 : i32
  }
  func.func @transform_2(%arg0: i32, %arg1: i32) -> (i32, i32) {
    %c0_i32 = arith.constant 0 : i32
    return %arg0, %arg1 : i32, i32
  }
  func.func @transform_3(%arg0: i32, %arg1: i32) -> (i32, i32) {
    %c0_i32 = arith.constant 0 : i32
    return %arg0, %arg1 : i32, i32
  }
}

</mosaic_0001>

<bundles_post_ra>
// kernel: tpu_custom_call.1
= control target key start
LH: loop header
LB: loop body
LE: loop exit
PB: predicated region body
PF: predicated region fallthrough
CT: control target
= control target key end

     0   :  { %s834_s0 = inlined_call_operand.vmem [shape: f32[4], index: 0, kind: input, shape index: {}]   ;;  %s835_s1 = inlined_call_operand.<no memory space> [shape: f32[1], index: 1, kind: input, shape index: {}]   ;;  %s836_s2 = inlined_call_operand.hbm [shape: f32[8,256], index: 2, kind: input, shape index: {}]   ;;  %s837_s3 = inlined_call_operand.hbm [shape: f32[8,256], index: 3, kind: output, shape index: {}]  }
   0x1   :  { %8 = sst [smem:[#allocation2]] %s835_s1 }
   0x2   :  { %9 = vsyncpa [#allocation6], 0 }
   0x3   :  { %10 = vsyncpa [#allocation4], 0 }
   0x4   :  { %12 = vsyncpa [#allocation4 + $0x1], 0 }
   0x5   :  { %13 = vsyncpa [#allocation5], 0 }
   0x6   :  { %15 = vsyncpa [#allocation5 + $0x1], 0  ;;  %s631_s14 = smov 0   ;;  %s633_s15 = smov 0  }
   0x7   :  { %s635_s16 = smov 0   ;;  %s637_s17 = smov 0  }
   0x8   :  { %s639_s18 = smov 0   ;;  %s641_s19 = smov 0  }
   0x9 LB: > { %s376_s1 = sadd.s32 4294967295, %s603_s19   ;;  %s377_s20 = sadd.s32 4294967294, %s603_s19   ;;  %s603_s19 = sphi %s641_s19, %s21_s19   ;;  %s599_s18 = sphi %s639_s18, %s859_s18   ;;  %s595_s17 = sphi %s637_s17, %s858_s17   ;;  %s591_s16 = sphi %s635_s16, %s857_s16   ;;  %s587_s15 = sphi %s633_s15, %s856_s15   ;;  %s583_s14 = sphi %s631_s14, %s855_s14  }
   0xa   : > { %p97_p0 = scmp.ne.s32.totalorder %s587_s15, %s583_s14  ;;  %p665_p1 = scmp.eq.s32.totalorder %s376_s1, 0 }
   0xb   : > { %p669_p2 = scmp.eq.s32.totalorder %s376_s1, 1  ;;  %p129_p3 = scmp.eq.s32.totalorder %s377_s20, 1 }
   0xc   : > { %s842_s21 = scalar_select %p665_p1, 1, 0 }
   0xd   : > { %p675_p4 = por %p665_p1, %p97_p0  ;;  %p378_p5 = scmp.ge.s32.totalorder %s603_s19, 1 }
   0xe   : > { %p680_p6 = por %p129_p3, %p97_p0  ;;  %p136_p7 = scmp.lt.s32.totalorder %s603_s19, 3 }
   0xf   : > { %s844_s23 = scalar_select %p675_p4, 1, 0 }
  0x10   : > { %s845_s24 = scalar_select %p680_p6, 1, 0 }
  0x11   : > { %s149_s27 = sshll.u32 %s834_s0, 4  ;;  %p688_p8 = pnand %p378_p5, %p136_p7  ;;  %s150_s27 = int_to_ptr.vmem [resolvable:$true] %s149_s27 }
  0x12   : > { %s30_s30 = sadd.s32 1, %s599_s18  ;;  %s84_s4 = sadd.s32 1, %s591_s16 }
  0x13   : > { %p403_p10 = pneg %p688_p8  ;;  %p31_p12 = scmp.ge.s32.totalorder %s30_s30, 2 }
  0x14   : > { %s472_s5 = scalar_lea.vmem %s150_s27, 16  ;;  %p480_p7 = scmp.lt.s32.totalorder %s150_s27, %s150_s27 }
  0x15   : > { %p697_p11 = pnand %p403_p10, %p665_p1  ;;  %p473_p13 = scmp.ne.s32.totalorder %s150_s27, %s472_s5 }
  0x16   : > { %p481_p6 = scmp.lt.s32.totalorder %s472_s5, %s472_s5 }
  0x17   : > { %p474_p0 = pneg %p697_p11 }
  0x18   : > { %p482_p9 = por %p481_p6, %p480_p7 }
  0x19   : > { %p475_p3 = pnand %p474_p0, %p473_p13 }
  0x1b   : > { %p476_p5 = pneg %p475_p3 }
  0x1d   : > { %p483_p4 = pnand %p482_p9, %p476_p5 }
  0x1f   : > { %486 = shalt.err (!%p483_p4)
}
  0x20   : > { %s605_s6 = smov [#allocation3]   ;;  %s861_s30 = smov (%p31_p12, %s30_s30), 0 }
  0x21   : > { %406 = dma.vmem_to_smem (!%p697_p11), %s150_s27, 16, %s605_s6, [#allocation6]  }
  0x22   : > { %p91_p10 = scmp.ne.s32.totalorder %s591_s16, %s587_s15  ;;  %p92_p6 = scmp.eq.s32.totalorder %s603_s19, 0 }
  0x23   : > { %s80_s7 = ssub.s32 %s599_s18, %s861_s30  ;;  %p416_p4 = scmp.lt.s32.totalorder %s603_s19, 2 }
  0x24   : > { %p82_p9 = scmp.eq.s32.totalorder %s80_s7, 0  ;;  %p93_p13 = por %p92_p6, %p91_p10 }
  0x25   : > { %p717_p0 = por %p669_p2, %p91_p10  ;;  %s163_s9 = sand.u32 1, %s591_s16  }
  0x26   : > { %s723_s10 = scalar_select %p82_p9, %s591_s16, %s84_s4  }
  0x27   : > { %s848_s8 = scalar_select %p717_p0, 1, 0 }
  0x28   : > { %s381_s11 = sshll.u32 %s163_s9, 3  ;;  %s382_s12 = sshll.u32 %s599_s18, 7 }
  0x29   : > { %s729_s20 = scalar_lea.hbm %s836_s2, %s382_s12  ;;  %s167_s25 = scalar_lea.vmem [#allocation7], %s381_s11 }
  0x2a   : > { %s176_s22 = sshll.u32 %s167_s25, 4  ;;  %p733_p2 = pnand %p416_p4, %p93_p13  ;;  %s731_s22 = int_to_ptr.vmem [resolvable:$true] %s176_s22 }
  0x2b   : > { %s164_s27 = scalar_lea.sflag [#allocation4], %s163_s9  ;;  %s487_s29 = scalar_lea.hbm %s729_s20, 128 }
  0x2c   : > { %p488_p11 = scmp.ne.s32.totalorder %s729_s20, %s487_s29  ;;  %p489_p12 = pneg %p733_p2 }
  0x2d   : > { %s492_s6 = scalar_lea.hbm %s836_s2, 256  ;;  %p493_p7 = scmp.lt.u32.totalorder %s729_s20, %s836_s2 }
  0x2e   : > { %p490_p3 = pnand %p489_p12, %p488_p11  ;;  %p494_p10 = scmp.lt.u32.totalorder %s492_s6, %s487_s29 }
  0x2f   : > { %p496_p4 = scmp.lt.u32.totalorder %s487_s29, %s729_s20 }
  0x30   : > { %p491_p5 = pneg %p490_p3  ;;  %p495_p6 = por %p494_p10, %p493_p7 }
  0x32   : > { %p497_p9 = por %p496_p4, %p495_p6 }
  0x34   : > { %p498_p13 = pnand %p497_p9, %p491_p5 }
  0x36   : > { %501 = shalt.err (!%p498_p13)
}
  0x37   : > { %s502_s9 = scalar_lea.vmem %s731_s22, 128  ;;  %s606_s12 = smov [#allocation7]  }
  0x38   : > { %p503_p11 = scmp.ne.s32.totalorder %s731_s22, %s502_s9  ;;  %s507_s13 = sshll.u32 %s606_s12, 4  ;;  %s508_s13 = int_to_ptr.vmem [resolvable:$false] %s507_s13 }
  0x39   : > { %s509_s1 = scalar_lea.vmem %s508_s13, 256  ;;  %p510_p1 = scmp.lt.s32.totalorder %s731_s22, %s508_s13 }
  0x3a   : > { %p505_p3 = pnand %p503_p11, %p489_p12  ;;  %p511_p7 = scmp.lt.s32.totalorder %s509_s1, %s502_s9 }
  0x3c   : > { %p506_p0 = pneg %p505_p3  ;;  %p512_p10 = por %p511_p7, %p510_p1 }
  0x3e   : > { %p513_p6 = pnand %p512_p10, %p506_p0 }
  0x40   : > { %516 = shalt.err (!%p513_p6)
}
  0x41   : > { %410 = dma.hbm_to_vmem [thread:$0]  (!%p733_p2), %s729_s20, 128, %s731_s22, %s164_s27  }
  0x42   : > { %185 = sbr.rel (%p688_p8) target bundleno = 144 (0x90), region = 32  ;;  %p850_p12 = scmp.ne.s32.totalorder (!%p688_p8), %s842_s21, 0 }
  0x49   : > { %570 = dma.done.wait (%p850_p12), [#allocation6], 16  }
  0x4a   : > { %572 = vsyncadd (%p850_p12), [#allocation6], 4294967280  ;;  %s769_s25 = sand.u32 1, %s587_s15   ;;  %p851_p1 = scmp.ne.s32.totalorder %s844_s23, 0 }
  0x4b   : > { %s385_s26 = sshll.u32 %s769_s25, 3  ;;  %s192_s29 = scalar_lea.sflag [#allocation4], %s769_s25 }
  0x4c   : > { %s195_s20 = scalar_lea.vmem [#allocation7], %s385_s26 }
  0x4d   : > { %574 = dma.done.wait (%p851_p1), %s192_s29, 128  }
  0x4e   : > { %576 = vsyncadd (%p851_p1), %s192_s29, 4294967168 }
  0x4f   : > { %200 = sfence }
  0x50   : > { %s220_s28 = sld [smem:[#allocation3]]  ;;  %s387_s21 = sld [smem:[#allocation3 + $0x1]]  ;;  %v219_v0 = vld [vmem:[%s195_s20] sm:$0xff]  ;;  %v253_v20 = vlaneseq  ;;  %vm263_vm0 = vcmask 1043456  }
  0x51   : > { %s388_s22 = sld [smem:[#allocation3 + $0x2]]  ;;  %s389_s27 = sld [smem:[#allocation3 + $0x3]] }
  0x52   : > { %s244_s4 = sld [smem:[#allocation2]]  ;;  %v254_v21 = vshrl.u32 %v253_v20, 7  ;;  %s218_s23 = scalar_lea.vmem [#allocation8], %s385_s26 }
  0x53   : > { %s282_s5 = sshll.u32 %s218_s23, 4  ;;  %s392_s6 = sshll.u32 %s595_s17, 7  ;;  %s782_s5 = int_to_ptr.vmem [resolvable:$true] %s282_s5 }
  0x54   : > { %v255_v22 = vsub.s32 0, %v254_v21  ;;  %v260_v23 = vsub.s32 4, %v254_v21  ;;  %s787_s9 = scalar_lea.hbm %s837_s3, %s392_s6  ;;  %s267_s12 = scalar_lea.sflag [#allocation5], %s769_s25 }
  0x55   : > { %s517_s13 = scalar_lea.vmem %s782_s5, 128  ;;  %p852_p0 = scmp.ne.s32.totalorder %s848_s8, 0 }
  0x56   : > { %v221_v1 = vstv %s220_s28  ;;  %v224_v2 = vstv %s387_s21  ;;  %p518_p8 = scmp.ne.s32.totalorder %s782_s5, %s517_s13  ;;  %s607_s17 = smov [#allocation8]  }
  0x57   : > { %v231_v3 = vstv %s388_s22  ;;  %v222_v4 = vmul.f32 %v221_v1, %v219_v0  ;;  %v225_v5 = vmul.f32 %v224_v2, %v219_v0  ;;  %v238_v7 = vstv %s389_s27  ;;  %s521_s1 = sshll.u32 %s607_s17, 4  ;;  %s522_s1 = int_to_ptr.vmem [resolvable:$false] %s521_s1 }
  0x58   : > { %v232_v6 = vmul.f32 %v231_v3, %v219_v0  ;;  %v239_v8 = vmul.f32 %v238_v7, %v219_v0  ;;  %v245_v14 = vstv %s244_s4  ;;  %p519_p2 = pnand %p518_p8, %p852_p0  ;;  %s523_s26 = scalar_lea.vmem %s522_s1, 256 }
  0x59   : > { %v227_v9 = vrot.slane %v225_v5, 1  ;;  %p524_p4 = scmp.lt.s32.totalorder %s782_s5, %s522_s1  ;;  %p525_p9 = scmp.lt.s32.totalorder %s523_s26, %s517_s13 }
  0x5a   : > { %v234_v10 = vrot.slane %v232_v6, 2  ;;  %v241_v12 = vrot.slane %v239_v8, 3  ;;  %p520_p5 = pneg %p519_p2 }
  0x5b   : > { %v229_v11 = vadd.f32 %v227_v9, %v222_v4  ;;  %p526_p13 = por %p525_p9, %p524_p4 }
  0x5d   : > { %v236_v13 = vadd.f32 %v234_v10, %v229_v11  ;;  %p527_p11 = pnand %p526_p13, %p520_p5 }
  0x5f   : > { %v243_v15 = vadd.f32 %v241_v12, %v236_v13 }
  0x61   : > { %v246_v16 = vadd.f32 %v245_v14, %v243_v15 }
  0x63   : > { %v390_v17 = vmul.f32 -1.442695, %v246_v16 }
  0x65   : > { %468 = vpow2.f32 %v390_v17 }
  0x6f   : > { %v469_v18 = vpop.eup %468 }
  0x70   : > { %v250_v19 = vadd.f32 1.0, %v469_v18 }
  0x72   : > { %470 = vrcp.f32 %v250_v19 }
  0x7c   : > { %v471_v24 = vpop.eup %470 }
  0x7d   : > { %v256_v25 = vrot.slane %v471_v24, %v255_v22  ;;  %v261_v26 = vrot.slane %v471_v24, %v260_v23 }
  0x7f   : > { %v257_v27 = vmul.f32 %v256_v25, %v219_v0  ;;  %v262_v28 = vmul.f32 %v261_v26, %v219_v0 }
  0x81   : > { %v264_v29 = vsel %vm263_vm0, %v257_v27, %v262_v28 }
  0x82   : > { %265 = vst [vmem:[%s218_s23] sm:$0xff] %v264_v29 }
  0x83   : > { %530 = shalt.err (!%p527_p11)
}
  0x84   : > { %s531_s25 = scalar_lea.hbm %s787_s9, 128  ;;  %s535_s28 = scalar_lea.hbm %s837_s3, 256 }
  0x85   : > { %p532_p3 = scmp.ne.s32.totalorder %s787_s9, %s531_s25  ;;  %p536_p6 = scmp.lt.u32.totalorder %s787_s9, %s837_s3 }
  0x86   : > { %p537_p12 = scmp.lt.u32.totalorder %s535_s28, %s531_s25  ;;  %p539_p8 = scmp.lt.u32.totalorder %s531_s25, %s787_s9 }
  0x87   : > { %p533_p7 = pnand %p532_p3, %p852_p0 }
  0x88   : > { %p538_p1 = por %p537_p12, %p536_p6 }
  0x89   : > { %p534_p10 = pneg %p533_p7 }
  0x8a   : > { %p540_p2 = por %p539_p8, %p538_p1 }
  0x8c   : > { %p541_p5 = pnand %p540_p2, %p534_p10 }
  0x8e   : > { %544 = shalt.err (!%p541_p5)
}
  0x8f   : > { %401 = dma.vmem_to_hbm [thread:$0]  (%p852_p0), %s782_s5, 128, %s787_s9, %s267_s12  }
  0x90 PF: > { %s294_s27 = sand.u32 1, %s583_s14   ;;  %p853_p4 = scmp.ne.s32.totalorder %s845_s24, 0 }
  0x91   : > { %p854_p9 = scmp.ge.s32.totalorder %s603_s19, 2  ;;  %s295_s4 = scalar_lea.sflag [#allocation5], %s294_s27 }
  0x93   : > { %p412_p13 = pnand %p854_p9, %p853_p4 }
  0x95   : > { %578 = dma.done.wait (!%p412_p13), %s295_s4, 128  }
  0x96   : > { %580 = vsyncadd (!%p412_p13), %s295_s4, 4294967168  ;;  %s21_s19 = sadd.s32 1, %s603_s19   ;;  %s855_s14 = smov %s587_s15 }
  0x97   : > { %p18_p11 = scmp.ge.s32.totalorder %s21_s19, 4   ;;  %s856_s15 = smov %s591_s16 }
  0x98   : > { %s857_s16 = smov %s723_s10  ;;  %s858_s17 = smov %s599_s18 }
  0x99   : > { %s859_s18 = smov %s861_s30  ;;  %20 = sbr.rel (!%p18_p11) target bundleno = 9 (0x9), region = 82 }
  0xa0   :  { %300 = vsyncpa [#allocation4], 1 }
  0xa1   :  { %302 = vsyncpa [#allocation4 + $0x1], 1 }
  0xa2   :  { %303 = vsyncpa [#allocation5], 1 }
  0xa3   :  { %305 = vsyncpa [#allocation5 + $0x1], 1 }
  0xa4   :  { %306 = vsyncpa [#allocation6], 1 }
  0xa5   :  { %308 = vsyncpa [#allocation6 + $0x1], 1 }

</bundles_post_ra>
